<compile_context>
chip_gen: v5e
topology: v5e:2x2
jax: 0.10.0
libtpu: 0.0.40
codegen_flags: <defaults>
</compile_context>

<pallas_src>
import jax
import jax.numpy as jnp
from jax import lax
from jax.experimental import pallas as pl
from jax.experimental.pallas import tpu as pltpu


# ---------------------------------------------------------------------------
# VMEM budgeting (generation aware).
# ---------------------------------------------------------------------------

def _round_up(x, m):
    return ((x + m - 1) // m) * m


def _vmem_budget():
    """Returns (tile-footprint budget, Mosaic scoped-VMEM limit) in bytes."""
    cap = None
    try:
        cap = int(getattr(pltpu.get_tpu_info(), "vmem_capacity_bytes", 0)) or None
    except Exception:
        cap = None
    if cap is None:
        cap = 64 * 1024 * 1024          # conservative (v7x per-TC VMEM)
    budget = int(cap * 0.60)            # tile footprint budget
    limit = int(cap * 0.75)             # scoped-VMEM limit, leaves headroom
    return budget, limit


def _block_footprint(nb, cb, hw, x_bytes, y_bytes):
    """Padded VMEM footprint of one grid step (double buffers + temporaries)."""
    cb8 = _round_up(cb, 8)
    hw128 = _round_up(hw, 128)
    x_blk = nb * cb8 * hw128 * x_bytes
    y_blk = nb * cb8 * hw128 * y_bytes
    stat_blk = nb * cb8 * 128 * 4       # (nb, cb, 1) f32 output, lane padded
    par_blk = cb8 * 128 * 4             # (cb, 4) f32 params, lane padded
    pipelined = 2 * (x_blk + y_blk + 2 * stat_blk + par_blk)   # double buffered
    temps = 2 * nb * cb8 * hw128 * 4    # in-kernel f32 temporaries (x upcast, d)
    return pipelined + temps


def _cb_candidates(C):
    cands = {C}
    for cb in range(8, C, 8):
        if C % cb == 0:
            cands.add(cb)
    return sorted(cands)


def _choose_cb(C, N, HW, x_bytes, y_bytes, budget):
    """Channel block for the single-sweep kernel, or None if nothing fits."""
    fitting = [cb for cb in _cb_candidates(C)
               if _block_footprint(N, cb, HW, x_bytes, y_bytes) <= budget]
    if not fitting:
        return None

    def pref(cb):
        steps = C // cb
        # (a) >= 4 grid steps so the HBM<->VMEM pipeline has work to overlap,
        # (b) even grid extent so v7x's 2 TensorCores split evenly,
        # (c) then the largest fitting block (per-step overhead amortization).
        return (steps >= 4, steps % 2 == 0, cb)

    return max(fitting, key=pref)


def _choose_fallback_tiles(C, N, HW, x_bytes, y_bytes, budget):
    cands = _cb_candidates(C)
    cb = None
    for c in sorted(cands, reverse=True):
        if _block_footprint(1, c, HW, x_bytes, y_bytes) <= budget:
            cb = c
            break
    if cb is None:
        # TODO(synk): also tile the spatial (HW) axis for extreme H*W; the
        # fallback currently assumes a single (1, cb_min, HW) block fits VMEM.
        cb = min(cands)
    nb = 1
    for d in sorted((d for d in range(1, N + 1) if N % d == 0), reverse=True):
        if _block_footprint(d, cb, HW, x_bytes, y_bytes) <= budget:
            nb = d
            break
    return cb, nb


# ---------------------------------------------------------------------------
# Kernels.
# ---------------------------------------------------------------------------

def _make_fused_kernel(alpha, eps, n, hw):
    a = float(alpha)
    oma = 1.0 - a
    eps = float(eps)
    inv_count = 1.0 / float(n * hw)
    inv_hw = 1.0 / float(hw)

    def kernel(x_ref, p_ref, y_ref, mean_ref, var_ref):
        x = x_ref[...].astype(jnp.float32)              # (N, cb, HW)
        p = p_ref[...]                                   # (cb, 4) f32
        cb = p.shape[0]
        rm = p[:, 0:1].reshape(1, cb, 1)
        rv = p[:, 1:2].reshape(1, cb, 1)
        w = p[:, 2:3].reshape(1, cb, 1)
        b = p[:, 3:4].reshape(1, cb, 1)

        # Pass 1: per-(n,c) lane partials, reused for batch mean AND Y means.
        s1 = jnp.sum(x, axis=2, keepdims=True)           # (N, cb, 1)
        ex = jnp.sum(s1, axis=0, keepdims=True) * inv_count
        mu = oma * ex + a * rm                           # alpha-mixed mean

        # Pass 2: cancellation-safe moment around mu; `d` is reused for Y.
        d = x - mu
        s2 = jnp.sum(d * d, axis=2, keepdims=True)       # (N, cb, 1)
        bvar = jnp.sum(s2, axis=0, keepdims=True) * inv_count
        sigma = oma * bvar + a * rv
        inv_std = lax.rsqrt(sigma + eps)                 # EUP slot
        scale = w * inv_std                              # (1, cb, 1)

        # The only full-size elementwise write.
        y_ref[...] = (d * scale + b).astype(y_ref.dtype)

        # Y statistics derived algebraically from the partial sums (no second
        # elementwise pass / lane reduce over Y):
        #   mean_nc(Y) = scale * (E_nc[x] - mu) + b
        #   var_nc(Y)  = scale^2 * (E_nc[(x-mu)^2] - (E_nc[x] - mu)^2)
        dmu = s1 * inv_hw - mu                           # (N, cb, 1)
        mean_ref[...] = scale * dmu + b
        var_ref[...] = (scale * scale) * (s2 * inv_hw - dmu * dmu)

    return kernel


def _make_stats_kernel(alpha, eps, count):
    a = float(alpha)
    oma = 1.0 - a
    eps = float(eps)
    inv_count = 1.0 / float(count)

    def kernel(x_ref, p_ref, ss_ref, s1_acc, s2_acc):
        nblk = pl.program_id(1)

        @pl.when(nblk == 0)
        def _init():
            s1_acc[...] = jnp.zeros_like(s1_acc)
            s2_acc[...] = jnp.zeros_like(s2_acc)

        x = x_ref[...].astype(jnp.float32)               # (nb, cb, HW)
        s1_acc[...] += jnp.sum(x, axis=(0, 2), keepdims=True)
        s2_acc[...] += jnp.sum(x * x, axis=(0, 2), keepdims=True)

        @pl.when(nblk == pl.num_programs(1) - 1)
        def _finalize():
            p = p_ref[...]                               # (cb, 4)
            cb = p.shape[0]
            rm = p[:, 0:1].reshape(1, cb, 1)
            rv = p[:, 1:2].reshape(1, cb, 1)
            w = p[:, 2:3].reshape(1, cb, 1)
            b = p[:, 3:4].reshape(1, cb, 1)
            ex = s1_acc[...] * inv_count
            ex2 = s2_acc[...] * inv_count
            mu = oma * ex + a * rm
            # One-pass variance around the mixed mean (x is not resident across
            # the batch blocks, so the two-pass form is unavailable here).
            bvar = ex2 - 2.0 * mu * ex + mu * mu
            sigma = oma * bvar + a * rv
            inv_std = lax.rsqrt(sigma + eps)
            scale = w * inv_std
            shift = b - mu * scale
            ss_ref[0:1] = scale
            ss_ref[1:2] = shift

    return kernel


def _make_apply_kernel(hw):
    inv_hw = 1.0 / float(hw)

    def kernel(x_ref, ss_ref, y_ref, mean_ref, var_ref):
        x = x_ref[...].astype(jnp.float32)               # (nb, cb, HW)
        scale = ss_ref[0:1]                               # (1, cb, 1)
        shift = ss_ref[1:2]
        y_ref[...] = (x * scale + shift).astype(y_ref.dtype)

        s1 = jnp.sum(x, axis=2, keepdims=True)            # (nb, cb, 1)
        s2 = jnp.sum(x * x, axis=2, keepdims=True)
        m = s1 * inv_hw
        mean_ref[...] = scale * m + shift
        var_ref[...] = (scale * scale) * (s2 * inv_hw - m * m)

    return kernel


# ---------------------------------------------------------------------------
# Wrappers.
# ---------------------------------------------------------------------------

def _two_sweep_forward(x, params, N, C, HW, alpha, eps, cb, nb, vmem_limit,
                       in_dtype):
    grid = (C // cb, N // nb)

    scale_shift = pl.pallas_call(
        _make_stats_kernel(alpha, eps, N * HW),
        out_shape=jax.ShapeDtypeStruct((2, C, 1), jnp.float32),
        grid=grid,
        in_specs=[
            pl.BlockSpec((nb, cb, HW), lambda c, n: (n, c, 0)),
            pl.BlockSpec((cb, 4), lambda c, n: (c, 0)),
        ],
        out_specs=pl.BlockSpec((2, cb, 1), lambda c, n: (0, c, 0)),
        scratch_shapes=[pltpu.VMEM((1, cb, 1), jnp.float32),
                        pltpu.VMEM((1, cb, 1), jnp.float32)],
        compiler_params=pltpu.CompilerParams(
            dimension_semantics=("parallel", "arbitrary"),
            vmem_limit_bytes=vmem_limit),
    )(x, params)

    y, mean3, var3 = pl.pallas_call(
        _make_apply_kernel(HW),
        out_shape=(
            jax.ShapeDtypeStruct((N, C, HW), in_dtype),
            jax.ShapeDtypeStruct((N, C, 1), jnp.float32),
            jax.ShapeDtypeStruct((N, C, 1), jnp.float32),
        ),
        grid=grid,
        in_specs=[
            pl.BlockSpec((nb, cb, HW), lambda c, n: (n, c, 0)),
            pl.BlockSpec((2, cb, 1), lambda c, n: (0, c, 0)),
        ],
        out_specs=(
            pl.BlockSpec((nb, cb, HW), lambda c, n: (n, c, 0)),
            pl.BlockSpec((nb, cb, 1), lambda c, n: (n, c, 0)),
            pl.BlockSpec((nb, cb, 1), lambda c, n: (n, c, 0)),
        ),
        compiler_params=pltpu.CompilerParams(
            dimension_semantics=("parallel", "parallel"),
            vmem_limit_bytes=vmem_limit),
    )(x, scale_shift)
    return y, mean3, var3


def my_batch_norm_forward(x_nchw, running_mean, running_var, weight, bias,
                          alpha=0.5, eps=1e-5, *, force_two_pass=False,
                          nb_override=None):
    """Pallas implementation of MyBatchNorm.forward (first call, reset_mean=True).

    Returns:
      Y:     (N, C, H, W) in the input dtype
      means: (N, C) float32   (== self.stat[0])
      vars:  (N, C) float32   (== self.stat[1])
    """
    N, C, H, W = x_nchw.shape
    HW = H * W
    in_dtype = x_nchw.dtype

    # Reshape-only glue (no HBM traffic, no wrapper dtype cast).
    x = x_nchw.reshape(N, C, HW)
    params = jnp.stack(
        [running_mean.reshape(-1).astype(jnp.float32),
         running_var.reshape(-1).astype(jnp.float32),
         weight.reshape(-1).astype(jnp.float32),
         bias.reshape(-1).astype(jnp.float32)],
        axis=1)                                            # (C, 4), tiny

    budget, vmem_limit = _vmem_budget()
    ib = jnp.dtype(in_dtype).itemsize
    cb = None if force_two_pass else _choose_cb(C, N, HW, ib, ib, budget)

    if cb is not None:
        grid = (C // cb,)
        y, mean3, var3 = pl.pallas_call(
            _make_fused_kernel(alpha, eps, N, HW),
            out_shape=(
                jax.ShapeDtypeStruct((N, C, HW), in_dtype),
                jax.ShapeDtypeStruct((N, C, 1), jnp.float32),
                jax.ShapeDtypeStruct((N, C, 1), jnp.float32),
            ),
            grid=grid,
            in_specs=[
                pl.BlockSpec((N, cb, HW), lambda c: (0, c, 0)),
                pl.BlockSpec((cb, 4), lambda c: (c, 0)),
            ],
            out_specs=(
                pl.BlockSpec((N, cb, HW), lambda c: (0, c, 0)),
                pl.BlockSpec((N, cb, 1), lambda c: (0, c, 0)),
                pl.BlockSpec((N, cb, 1), lambda c: (0, c, 0)),
            ),
            compiler_params=pltpu.CompilerParams(
                dimension_semantics=("parallel",),
                vmem_limit_bytes=vmem_limit),
        )(x, params)
    else:
        fcb, fnb = _choose_fallback_tiles(C, N, HW, ib, ib, budget)
        if nb_override is not None:
            fnb = nb_override
        y, mean3, var3 = _two_sweep_forward(
            x, params, N, C, HW, alpha, eps, fcb, fnb, vmem_limit, in_dtype)

    return y.reshape(N, C, H, W), mean3.reshape(N, C), var3.reshape(N, C)


# ---------------------------------------------------------------------------
# Pure-JAX reference mirroring the PyTorch module (first call).
# ---------------------------------------------------------------------------

def _reference(x, rm, rv, w, b, alpha, eps):
    x = x.astype(jnp.float32)
    rm4 = rm.reshape(1, -1, 1, 1)
    rv4 = rv.reshape(1, -1, 1, 1)
    w4 = w.reshape(1, -1, 1, 1)
    b4 = b.reshape(1, -1, 1, 1)
    mu = (1 - alpha) * jnp.mean(x, axis=(0, 2, 3), keepdims=True) + alpha * rm4
    sigma = (1 - alpha) * jnp.mean((x - mu) ** 2, axis=(0, 2, 3), keepdims=True) + alpha * rv4
    x_hat = (x - mu) / jnp.sqrt(sigma + eps)
    y = w4 * x_hat + b4
    means = jnp.mean(y, axis=(2, 3))
    vars_ = jnp.mean((y - means[:, :, None, None]) ** 2, axis=(2, 3))
    return y, means, vars_


if __name__ == "__main__":
    key = jax.random.PRNGKey(0)
    k1, k2, k3, k4, k5 = jax.random.split(key, 5)

    N, C, H, W = 2, 4, 16, 16
    alpha, eps = 0.5, 1e-5

    x = jax.random.normal(k1, (N, C, H, W), dtype=jnp.float32)
    # Deterministic "module" parameters (shapes from nn.BatchNorm2d(C)).
    running_mean = jax.random.normal(k2, (C,), dtype=jnp.float32) * 0.1
    running_var = jnp.abs(jax.random.normal(k3, (C,), dtype=jnp.float32)) + 0.5
    weight = 1.0 + 0.1 * jax.random.normal(k4, (C,), dtype=jnp.float32)
    bias = 0.1 * jax.random.normal(k5, (C,), dtype=jnp.float32)

    y_ref, m_ref, v_ref = _reference(x, running_mean, running_var, weight, bias,
                                     alpha, eps)

    # 1) Fused single-sweep path (f32 I/O).
    y, means, vars_ = my_batch_norm_forward(
        x, running_mean, running_var, weight, bias, alpha=alpha, eps=eps)
    jax.block_until_ready((y, means, vars_))
    assert y.dtype == x.dtype
    assert jnp.allclose(y, y_ref, atol=1e-4, rtol=1e-4)
    assert jnp.allclose(means, m_ref, atol=1e-4, rtol=1e-4)
    assert jnp.allclose(vars_, v_ref, atol=1e-4, rtol=1e-4)

    # 2) Two-sweep fallback path (forced; nb=1 exercises real accumulation
    #    across batch blocks in the stats kernel).
    y2, means2, vars2 = my_batch_norm_forward(
        x, running_mean, running_var, weight, bias, alpha=alpha, eps=eps,
        force_two_pass=True, nb_override=1)
    jax.block_until_ready((y2, means2, vars2))
    assert jnp.allclose(y2, y_ref, atol=1e-4, rtol=1e-4)
    assert jnp.allclose(means2, m_ref, atol=1e-4, rtol=1e-4)
    assert jnp.allclose(vars2, v_ref, atol=1e-4, rtol=1e-4)

    # 3) bf16 I/O path (halves HBM traffic on this bandwidth-bound op); the
    #    arithmetic stays in f32 inside the kernel.
    x_bf16 = x.astype(jnp.bfloat16)
    y_ref16, m_ref16, v_ref16 = _reference(
        x_bf16.astype(jnp.float32), running_mean, running_var, weight, bias,
        alpha, eps)
    y3, means3, vars3 = my_batch_norm_forward(
        x_bf16, running_mean, running_var, weight, bias, alpha=alpha, eps=eps)
    jax.block_until_ready((y3, means3, vars3))
    assert y3.dtype == jnp.bfloat16
    assert jnp.allclose(y3.astype(jnp.float32), y_ref16, atol=5e-2, rtol=5e-2)
    assert jnp.allclose(means3, m_ref16, atol=1e-3, rtol=1e-3)
    assert jnp.allclose(vars3, v_ref16, atol=1e-3, rtol=1e-3)

    print("KERNEL_OK")
</pallas_src>

<mosaic_0001>
module attributes {stable_mosaic.version = 11 : i64} {
  func.func @kernel(%arg0: i32, %arg1: memref<2x4x256xf32, #tpu.memory_space<vmem>>, %arg2: memref<4x4xf32, #tpu.memory_space<vmem>>, %arg3: memref<2x4x256xf32, #tpu.memory_space<vmem>>, %arg4: memref<2x4x1xf32, #tpu.memory_space<vmem>>, %arg5: memref<2x4x1xf32, #tpu.memory_space<vmem>>) attributes {dimension_semantics = [#tpu.dimension_semantics<parallel>], iteration_bounds = array<i64: 1>, scalar_prefetch = 0 : i64, scratch_operands = 0 : i64, tpu.core_type = #tpu.core_type<tc>, window_params = [{transform_indices = @transform_0, window_bounds = array<i64: 2, 4, 256>}, {transform_indices = @transform_1, window_bounds = array<i64: 4, 4>}, {transform_indices = @transform_2, window_bounds = array<i64: 2, 4, 256>}, {transform_indices = @transform_3, window_bounds = array<i64: 2, 4, 1>}, {transform_indices = @transform_4, window_bounds = array<i64: 2, 4, 1>}]} {
    %c0 = arith.constant 0 : index
    %c0_0 = arith.constant 0 : index
    %c0_1 = arith.constant 0 : index
    %0 = vector.load %arg1[%c0, %c0_0, %c0_1] : memref<2x4x256xf32, #tpu.memory_space<vmem>>, vector<2x4x256xf32>
    %c0_2 = arith.constant 0 : index
    %c0_3 = arith.constant 0 : index
    %1 = vector.load %arg2[%c0_2, %c0_3] : memref<4x4xf32, #tpu.memory_space<vmem>>, vector<4x4xf32>
    %2 = vector.extract_strided_slice %1 {offsets = [0, 0], sizes = [4, 1], strides = [1, 1]} : vector<4x4xf32> to vector<4x1xf32>
    %3 = vector.shape_cast %2 : vector<4x1xf32> to vector<1x4x1xf32>
    %4 = vector.extract_strided_slice %1 {offsets = [0, 1], sizes = [4, 1], strides = [1, 1]} : vector<4x4xf32> to vector<4x1xf32>
    %5 = vector.shape_cast %4 : vector<4x1xf32> to vector<1x4x1xf32>
    %6 = vector.extract_strided_slice %1 {offsets = [0, 2], sizes = [4, 1], strides = [1, 1]} : vector<4x4xf32> to vector<4x1xf32>
    %7 = vector.shape_cast %6 : vector<4x1xf32> to vector<1x4x1xf32>
    %8 = vector.extract_strided_slice %1 {offsets = [0, 3], sizes = [4, 1], strides = [1, 1]} : vector<4x4xf32> to vector<4x1xf32>
    %9 = vector.shape_cast %8 : vector<4x1xf32> to vector<1x4x1xf32>
    %cst = arith.constant dense<0.000000e+00> : vector<2x4xf32>
    %10 = vector.multi_reduction <add>, %0, %cst [2] : vector<2x4x256xf32> to vector<2x4xf32>
    %11 = vector.shape_cast %10 : vector<2x4xf32> to vector<2x4x1xf32>
    %cst_4 = arith.constant dense<0.000000e+00> : vector<4x1xf32>
    %12 = vector.multi_reduction <add>, %11, %cst_4 [0] : vector<2x4x1xf32> to vector<4x1xf32>
    %13 = vector.shape_cast %12 : vector<4x1xf32> to vector<1x4x1xf32>
    %cst_5 = arith.constant 0.001953125 : f32
    %14 = vector.broadcast %cst_5 : f32 to vector<1x4x1xf32>
    %15 = arith.mulf %13, %14 : vector<1x4x1xf32>
    %cst_6 = arith.constant 5.000000e-01 : f32
    %16 = vector.broadcast %cst_6 : f32 to vector<1x4x1xf32>
    %17 = arith.mulf %16, %15 : vector<1x4x1xf32>
    %cst_7 = arith.constant 5.000000e-01 : f32
    %18 = vector.broadcast %cst_7 : f32 to vector<1x4x1xf32>
    %19 = arith.mulf %18, %3 : vector<1x4x1xf32>
    %20 = arith.addf %17, %19 : vector<1x4x1xf32>
    %21 = vector.broadcast %20 : vector<1x4x1xf32> to vector<2x4x256xf32>
    %22 = arith.subf %0, %21 : vector<2x4x256xf32>
    %23 = arith.mulf %22, %22 : vector<2x4x256xf32>
    %cst_8 = arith.constant dense<0.000000e+00> : vector<2x4xf32>
    %24 = vector.multi_reduction <add>, %23, %cst_8 [2] : vector<2x4x256xf32> to vector<2x4xf32>
    %25 = vector.shape_cast %24 : vector<2x4xf32> to vector<2x4x1xf32>
    %cst_9 = arith.constant dense<0.000000e+00> : vector<4x1xf32>
    %26 = vector.multi_reduction <add>, %25, %cst_9 [0] : vector<2x4x1xf32> to vector<4x1xf32>
    %27 = vector.shape_cast %26 : vector<4x1xf32> to vector<1x4x1xf32>
    %cst_10 = arith.constant 0.001953125 : f32
    %28 = vector.broadcast %cst_10 : f32 to vector<1x4x1xf32>
    %29 = arith.mulf %27, %28 : vector<1x4x1xf32>
    %cst_11 = arith.constant 5.000000e-01 : f32
    %30 = vector.broadcast %cst_11 : f32 to vector<1x4x1xf32>
    %31 = arith.mulf %30, %29 : vector<1x4x1xf32>
    %cst_12 = arith.constant 5.000000e-01 : f32
    %32 = vector.broadcast %cst_12 : f32 to vector<1x4x1xf32>
    %33 = arith.mulf %32, %5 : vector<1x4x1xf32>
    %34 = arith.addf %31, %33 : vector<1x4x1xf32>
    %cst_13 = arith.constant 9.99999974E-6 : f32
    %35 = vector.broadcast %cst_13 : f32 to vector<1x4x1xf32>
    %36 = arith.addf %34, %35 : vector<1x4x1xf32>
    %37 = math.rsqrt %36 : vector<1x4x1xf32>
    %38 = arith.mulf %7, %37 : vector<1x4x1xf32>
    %39 = vector.broadcast %38 : vector<1x4x1xf32> to vector<2x4x256xf32>
    %40 = arith.mulf %22, %39 : vector<2x4x256xf32>
    %41 = vector.broadcast %9 : vector<1x4x1xf32> to vector<2x4x256xf32>
    %42 = arith.addf %40, %41 : vector<2x4x256xf32>
    %c0_14 = arith.constant 0 : index
    %c0_15 = arith.constant 0 : index
    %c0_16 = arith.constant 0 : index
    %43 = vector.load %arg3[%c0_14, %c0_15, %c0_16] : memref<2x4x256xf32, #tpu.memory_space<vmem>>, vector<2x4x256xf32>
    tpu.vector_store %arg3[%c0_14, %c0_15, %c0_16], %42 {strides = array<i32>} : memref<2x4x256xf32, #tpu.memory_space<vmem>>, vector<2x4x256xf32>,
    %cst_17 = arith.constant 3.906250e-03 : f32
    %44 = vector.broadcast %cst_17 : f32 to vector<2x4x1xf32>
    %45 = arith.mulf %11, %44 : vector<2x4x1xf32>
    %46 = vector.broadcast %20 : vector<1x4x1xf32> to vector<2x4x1xf32>
    %47 = arith.subf %45, %46 : vector<2x4x1xf32>
    %48 = vector.broadcast %38 : vector<1x4x1xf32> to vector<2x4x1xf32>
    %49 = arith.mulf %48, %47 : vector<2x4x1xf32>
    %50 = vector.broadcast %9 : vector<1x4x1xf32> to vector<2x4x1xf32>
    %51 = arith.addf %49, %50 : vector<2x4x1xf32>
    %c0_18 = arith.constant 0 : index
    %c0_19 = arith.constant 0 : index
    %c0_20 = arith.constant 0 : index
    %52 = vector.load %arg4[%c0_18, %c0_19, %c0_20] : memref<2x4x1xf32, #tpu.memory_space<vmem>>, vector<2x4x1xf32>
    tpu.vector_store %arg4[%c0_18, %c0_19, %c0_20], %51 {strides = array<i32>} : memref<2x4x1xf32, #tpu.memory_space<vmem>>, vector<2x4x1xf32>,
    %53 = arith.mulf %38, %38 : vector<1x4x1xf32>
    %cst_21 = arith.constant 3.906250e-03 : f32
    %54 = vector.broadcast %cst_21 : f32 to vector<2x4x1xf32>
    %55 = arith.mulf %25, %54 : vector<2x4x1xf32>
    %56 = arith.mulf %47, %47 : vector<2x4x1xf32>
    %57 = arith.subf %55, %56 : vector<2x4x1xf32>
    %58 = vector.broadcast %53 : vector<1x4x1xf32> to vector<2x4x1xf32>
    %59 = arith.mulf %58, %57 : vector<2x4x1xf32>
    %c0_22 = arith.constant 0 : index
    %c0_23 = arith.constant 0 : index
    %c0_24 = arith.constant 0 : index
    %60 = vector.load %arg5[%c0_22, %c0_23, %c0_24] : memref<2x4x1xf32, #tpu.memory_space<vmem>>, vector<2x4x1xf32>
    tpu.vector_store %arg5[%c0_22, %c0_23, %c0_24], %59 {strides = array<i32>} : memref<2x4x1xf32, #tpu.memory_space<vmem>>, vector<2x4x1xf32>,
    return
  }
  func.func @transform_0(%arg0: i32) -> (i32, i32, i32) {
    %c0_i32 = arith.constant 0 : i32
    %c0_i32_0 = arith.constant 0 : i32
    %c0_i32_1 = arith.constant 0 : i32
    return %c0_i32, %arg0, %c0_i32_0 : i32, i32, i32
  }
  func.func @transform_1(%arg0: i32) -> (i32, i32) {
    %c0_i32 = arith.constant 0 : i32
    %c0_i32_0 = arith.constant 0 : i32
    return %arg0, %c0_i32 : i32, i32
  }
  func.func @transform_2(%arg0: i32) -> (i32, i32, i32) {
    %c0_i32 = arith.constant 0 : i32
    %c0_i32_0 = arith.constant 0 : i32
    %c0_i32_1 = arith.constant 0 : i32
    return %c0_i32, %arg0, %c0_i32_0 : i32, i32, i32
  }
  func.func @transform_3(%arg0: i32) -> (i32, i32, i32) {
    %c0_i32 = arith.constant 0 : i32
    %c0_i32_0 = arith.constant 0 : i32
    %c0_i32_1 = arith.constant 0 : i32
    return %c0_i32, %arg0, %c0_i32_0 : i32, i32, i32
  }
  func.func @transform_4(%arg0: i32) -> (i32, i32, i32) {
    %c0_i32 = arith.constant 0 : i32
    %c0_i32_0 = arith.constant 0 : i32
    %c0_i32_1 = arith.constant 0 : i32
    return %c0_i32, %arg0, %c0_i32_0 : i32, i32, i32
  }
}

</mosaic_0001>

<bundles_post_ra>
// kernel: tpu_custom_call.1
= control target key start
LH: loop header
LB: loop body
LE: loop exit
PB: predicated region body
PF: predicated region fallthrough
CT: control target
= control target key end

     0   :  { %10 = vsyncpa [#allocation3], 0  ;;  %s445_s0 = inlined_call_operand.hbm [shape: f32[2,4,256], index: 0, kind: input, shape index: {}]   ;;  %s446_s1 = inlined_call_operand.hbm [shape: f32[4,4], index: 1, kind: input, shape index: {}]   ;;  %s447_s2 = inlined_call_operand.hbm [shape: f32[2,4,256], index: 2, kind: output, shape index: {0}]   ;;  %s448_s3 = inlined_call_operand.vmem [shape: f32[2,4,1], index: 3, kind: output, shape index: {1}]   ;;  %s449_s4 = inlined_call_operand.vmem [shape: f32[2,4,1], index: 4, kind: output, shape index: {2}]  }
   0x1   :  { %11 = vsyncpa [#allocation6], 0 }
   0x2   :  { %12 = vsyncpa [#allocation4], 0  ;;  %s17_s17 = sshll.u32 %s445_s0, 4  ;;  %s343_s18 = smov [#allocation2]   ;;  %s18_s17 = int_to_ptr.hbm [resolvable:$true] %s17_s17 }
   0x3   :  { %s19_s19 = sshll.u32 %s343_s18, 4  ;;  %s31_s22 = sshll.u32 %s446_s1, 4  ;;  %s20_s19 = int_to_ptr.vmem [resolvable:$true] %s19_s19  ;;  %s32_s22 = int_to_ptr.hbm [resolvable:$true] %s31_s22 }
   0x4   :  { %s344_s23 = smov 128   ;;  %s345_s24 = smov 8  }
   0x5   :  { %25 = dma.hbm_to_vmem [thread:$0]  %s18_s17, 256, %s20_s19, [#allocation3], %s344_s23, %s344_s23, %s345_s24  }
   0x6   :  { %s346_s25 = smov [#allocation5]  }
   0x7   :  { %s33_s26 = sshll.u32 %s346_s25, 4  ;;  %s34_s26 = int_to_ptr.vmem [resolvable:$true] %s33_s26 }
   0x8   :  { %36 = dma.hbm_to_vmem [thread:$0]  %s32_s22, 64, %s34_s26, [#allocation6]  }
   0x9   :  { %337 = dma.done.wait [#allocation3], 256  }
   0xa   :  { %338 = vsyncadd [#allocation3], 4294967040 }
   0xb   :  { %339 = dma.done.wait [#allocation6], 64  }
   0xc   :  { %340 = vsyncadd [#allocation6], 4294967232  ;;  %v45_v0 = vld [vmem:[#allocation2] sm:$0xff]  ;;  %v46_v1 = vld [vmem:[#allocation2 + $0x8] sm:$0xff]  ;;  %vm61_vm0 = vcmask 1043456   ;;  %v347_v12 = vmov 0  }
   0xd   :  { %50 = vst [vmem:[#allocation1] ss:$2 sm:$0xff] %v45_v0  ;;  %259 = vset.pattern.permute.xlu1 %v347_v12  ;;  %v395_v16 = vld [vmem:[#allocation5] sm:$0xf]  ;;  %s348_s0 = smov 2   ;;  %s349_s1 = smov 127  }
   0xe   :  { %54 = vst [vmem:[#allocation1 + $0x10] ss:$2 sm:$0xff] %v46_v1  ;;  %v77_v19 = vmul.f32 0.5, %v395_v16  ;;  %v350_v25 = vmov 839922192   ;;  %v351_v56 = vmov 3  }
   0xf   :  { %v84_v26 = vunpack.c.l.s4 %v350_v25  ;;  %262 = vset.pattern.permute.xlu0 %v351_v56  ;;  %s352_s27 = smov 1   ;;  %s354_s28 = smov 126   ;;  %vm188_vm4 = vcmask 3072  }
  0x10   :  { %s355_s29 = smov [#allocation7]   ;;  %s224_s7 = sshll.u32 %s447_s2, 4  ;;  %s225_s7 = int_to_ptr.hbm [resolvable:$true] %s224_s7 }
  0x11   :  { %v401_v27 = vunpack.c.0.s8 %v84_v26  ;;  %s222_s30 = sshll.u32 %s355_s29, 4  ;;  %s223_s30 = int_to_ptr.vmem [resolvable:$true] %s222_s30 }
  0x14   :  { %v51_v2 = vld.sshfl [vmem:[#allocation1] sm:$0xff pattern:$0x75316420]  ;;  %v52_v3 = vld.sshfl [vmem:[#allocation1 + $0x8] sm:$0xff pattern:$0x75316420] }
  0x15   :  { %v62_v4 = vsel %vm61_vm0, %v51_v2, 0.0  ;;  %v63_v5 = vsel %vm61_vm0, %v52_v3, 0.0  ;;  %v55_v7 = vld.sshfl [vmem:[#allocation1 + $0x10] sm:$0xff pattern:$0x75316420] }
  0x16   :  { %v64_v6 = vadd.f32 %v63_v5, %v62_v4  ;;  %v56_v8 = vld.sshfl [vmem:[#allocation1 + $0x18] sm:$0xff pattern:$0x75316420]  ;;  %v67_v9 = vsel %vm61_vm0, %v55_v7, 0.0  ;;  %v353_v5 = vmov 2  }
  0x17   :  { %v68_v10 = vsel %vm61_vm0, %v56_v8, 0.0  ;;  %260 = vset.pattern.permute.xlu2 %v353_v5 }
  0x18   :  { %65 = vadd.xlane.f32.xlu0 %v64_v6  ;;  %v69_v11 = vadd.f32 %v68_v10, %v67_v9 }
  0x20   :  { %70 = vadd.xlane.f32.xlu0 %v69_v11 }
  0x8b   :  { %v66_v13 = vpop.xlane.xlu0 %65 }
  0x8c   :  { %v72_v15 = vsel %vm61_vm0, %v66_v13, 0.0  ;;  %v161_v22 = vmul.f32 0.00390625, %v66_v13 }
  0x93   :  { %v71_v14 = vpop.xlane.xlu0 %70 }
  0x94   :  { %v73_v17 = vsel %vm61_vm0, %v71_v14, 0.0  ;;  %v162_v44 = vmul.f32 0.00390625, %v71_v14 }
  0x95   :  { %v74_v18 = vadd.f32 %v73_v17, %v72_v15 }
  0x97   :  { %v75_v20 = vmul.f32 0.001953125, %v74_v18 }
  0x99   :  { %v76_v21 = vmul.f32 0.5, %v75_v20 }
  0x9b   :  { %v78_v23 = vadd.f32 %v77_v19, %v76_v21 }
  0x9d   :  { %81 = vperm.xlu1 %259, %v78_v23   ;;  %v163_v24 = vsub.f32 %v161_v22, %v78_v23  ;;  %v164_v45 = vsub.f32 %v162_v44, %v78_v23 }
  0x9f   :  { %167 = vrot.lane.b32.xlu0 %v163_v24, %s348_s0  ;;  %v195_v50 = vmul.f32 %v164_v45, %v164_v45  ;;  %v194_v3 = vmul.f32 %v163_v24, %v163_v24 }
  0xa5   :  { %261 = vset.pattern.permute.xlu1 %v351_v56 }
  0xa7   :  { %175 = vrot.lane.b32.xlu0 %v395_v16, %s349_s1 }
 0x10f   :  { %v82_v28 = vpop.permute.xlu1 %81 }
 0x110   :  { %v86_v29 = vperm.slane %v82_v28, %v401_v27 }
 0x111   :  { %v168_v7 = vpop.permute.xlu0 %167 }
 0x112   :  { %v404_v30 = vsub.f32 %v45_v0, %v86_v29  ;;  %v406_v31 = vsub.f32 %v46_v1, %v86_v29 }
 0x114   :  { %v90_v32 = vmul.f32 %v404_v30, %v404_v30  ;;  %v91_v33 = vmul.f32 %v406_v31, %v406_v31 }
 0x116   :  { %94 = vst [vmem:[#allocation1] ss:$2 sm:$0xff] %v90_v32 }
 0x117   :  { %98 = vst [vmem:[#allocation1 + $0x10] ss:$2 sm:$0xff] %v91_v33 }
 0x119   :  { %v176_v11 = vpop.permute.xlu0 %175 }
 0x11d   :  { %v95_v34 = vld.sshfl [vmem:[#allocation1] sm:$0xff pattern:$0x75316420]  ;;  %v96_v35 = vld.sshfl [vmem:[#allocation1 + $0x8] sm:$0xff pattern:$0x75316420] }
 0x11e   :  { %v99_v36 = vld.sshfl [vmem:[#allocation1 + $0x10] sm:$0xff pattern:$0x75316420]  ;;  %v100_v37 = vld.sshfl [vmem:[#allocation1 + $0x18] sm:$0xff pattern:$0x75316420] }
 0x11f   :  { %v110_v38 = vsel %vm61_vm0, %v99_v36, 0.0  ;;  %v111_v39 = vsel %vm61_vm0, %v100_v37, 0.0  ;;  %v105_v40 = vsel %vm61_vm0, %v95_v34, 0.0  ;;  %v106_v41 = vsel %vm61_vm0, %v96_v35, 0.0 }
 0x120   :  { %v112_v42 = vadd.f32 %v111_v39, %v110_v38  ;;  %v107_v43 = vadd.f32 %v106_v41, %v105_v40 }
 0x122   :  { %113 = vadd.xlane.f32.xlu2 %v112_v42  ;;  %108 = vadd.xlane.f32.xlu1 %v107_v43 }
 0x13a   :  { %169 = vrot.lane.b32.xlu2 %v164_v45, %s348_s0 }
 0x13b   :  { %150 = vperm.xlu1 %261, %v395_v16  }
 0x195   :  { %v114_v46 = vpop.xlane.xlu2 %113  ;;  %v109_v47 = vpop.xlane.xlu1 %108 }
 0x196   :  { %v116_v48 = vsel %vm61_vm0, %v114_v46, 0.0  ;;  %v193_v49 = vmul.f32 0.00390625, %v114_v46  ;;  %v115_v51 = vsel %vm61_vm0, %v109_v47, 0.0  ;;  %v192_v2 = vmul.f32 0.00390625, %v109_v47 }
 0x197   :  { %v117_v52 = vadd.f32 %v116_v48, %v115_v51 }
 0x198   :  { %v197_v53 = vsub.f32 %v193_v49, %v195_v50  ;;  %v196_v4 = vsub.f32 %v192_v2, %v194_v3 }
 0x199   :  { %v118_v54 = vmul.f32 0.001953125, %v117_v52 }
 0x19a   :  { %202 = vrot.lane.b32.xlu0 %v197_v53, %s348_s0 }
 0x19b   :  { %v119_v55 = vmul.f32 0.5, %v118_v54 }
 0x19d   :  { %v120_v57 = vadd.f32 %v119_v55, %v77_v19  ;;  %v170_v6 = vpop.permute.xlu2 %169 }
 0x19f   :  { %v121_v58 = vadd.f32 1e-05, %v120_v57 }
 0x1a1   :  { %263 = vrsqrt.f32 %v121_v58  ;;  %vm128_vm2 = vweird.f32 %v121_v58 }
 0x1a7   :  { %v264_v59 = vpop.eup %263 }
 0x1a8   :  { %v123_v60 = vmul.f32 %v264_v59, %v121_v58  ;;  %vm129_vm1 = vweird.f32 %v264_v59 }
 0x1a9   :  { %vm130_vm3 = vmor %vm128_vm2, %vm129_vm1 }
 0x1aa   :  { %v124_v61 = vmul.f32 %v264_v59, %v123_v60 }
 0x1ac   :  { %v125_v62 = vmul.f32 0.5, %v124_v61 }
 0x1ad   :  { %v151_v21 = vpop.permute.xlu1 %150 }
 0x1ae   :  { %v126_v63 = vsub.f32 1.5, %v125_v62  ;;  %v155_v23 = vperm.slane %v151_v21, %v401_v27 }
 0x1b0   :  { %v127_v0 = vmul.f32 %v264_v59, %v126_v63 }
 0x1b2   :  { %v131_v1 = vsel %vm130_vm3, %v264_v59, %v127_v0 }
 0x1b3   :  { %133 = vrot.lane.b32.xlu2 %v131_v1, %s352_s27 }
 0x1bb   :  { %200 = vrot.lane.b32.xlu2 %v196_v4, %s348_s0 }
 0x20c   :  { %v203_v19 = vpop.permute.xlu0 %202 }
 0x20d   :  { %v134_v8 = vpop.permute.xlu2 %133 }
 0x20e   :  { %v136_v9 = vmul.f32 %v134_v8, %v395_v16 }
 0x210   :  { %139 = vperm.xlu2 %260, %v136_v9   ;;  %v173_v10 = vmul.f32 %v168_v7, %v136_v9  ;;  %v174_v13 = vmul.f32 %v170_v6, %v136_v9  ;;  %v191_v17 = vmul.f32 %v136_v9, %v136_v9 }
 0x212   :  { %v178_v12 = vadd.f32 %v176_v11, %v173_v10  ;;  %v179_v14 = vadd.f32 %v176_v11, %v174_v13  ;;  %v207_v20 = vmul.f32 %v203_v19, %v191_v17 }
 0x214   :  { %182 = vrot.lane.b32.xlu0 %v178_v12, %s354_s28 }
 0x215   :  { %v201_v15 = vpop.permute.xlu2 %200 }
 0x216   :  { %v206_v18 = vmul.f32 %v201_v15, %v191_v17 }
 0x218   :  { %184 = vrot.lane.b32.xlu2 %v179_v14, %s354_s28 }
 0x21c   :  { %210 = vrot.lane.b32.xlu0 %v206_v18, %s354_s28 }
 0x220   :  { %212 = vrot.lane.b32.xlu2 %v207_v20, %s354_s28 }
 0x26a   :  { %v140_v22 = vpop.permute.xlu2 %139 }
 0x26b   :  { %v144_v16 = vperm.slane %v140_v22, %v401_v27 }
 0x26d   :  { %v146_v24 = vmul.f32 %v144_v16, %v404_v30  ;;  %v147_v25 = vmul.f32 %v144_v16, %v406_v31 }
 0x26f   :  { %v157_v26 = vadd.f32 %v155_v23, %v146_v24  ;;  %v158_v28 = vadd.f32 %v155_v23, %v147_v25 }
 0x271   :  { %159 = vst [vmem:[#allocation7] sm:$0xff] %v157_v26 }
 0x272   :  { %160 = vst [vmem:[#allocation7 + $0x8] sm:$0xff] %v158_v28  ;;  %v185_v29 = vpop.permute.xlu2 %184 }
 0x273   :  { %190 = vst.msk [vmem:[%s448_s3 + $0x4] sm:$0xf] %vm188_vm4, %v185_v29 }
 0x274   :  { %230 = dma.vmem_to_hbm [thread:$0]  %s223_s30, 256, %s225_s7, [#allocation4], %s344_s23, %s344_s23, %s345_s24  }
 0x27a   :  { %v213_v27 = vpop.permute.xlu2 %212 }
 0x27b   :  { %217 = vst.msk [vmem:[%s449_s4 + $0x4] sm:$0xf] %vm188_vm4, %v213_v27 }
 0x286   :  { %v183_v30 = vpop.permute.xlu0 %182 }
 0x287   :  { %189 = vst.msk [vmem:[%s448_s3] sm:$0xf] %vm188_vm4, %v183_v30 }
 0x28e   :  { %v211_v31 = vpop.permute.xlu0 %210 }
 0x28f   :  { %216 = vst.msk [vmem:[%s449_s4] sm:$0xf] %vm188_vm4, %v211_v31 }
 0x290   :  { %341 = dma.done.wait [#allocation4], 256  }
 0x291   :  { %342 = vsyncadd [#allocation4], 4294967040 }
 0x292   :  { %243 = vsyncpa [#allocation3], 1 }
 0x293   :  { %244 = vsyncpa [#allocation6], 1 }
 0x294   :  { %245 = vsyncpa [#allocation4], 1 }

</bundles_post_ra>
